<compile_context>
chip_gen: v5e
topology: v5e:2x2
jax: 0.10.0
libtpu: 0.0.40
codegen_flags: <defaults>
</compile_context>

<pallas_src>
import enum
import functools

import jax
import jax.numpy as jnp
from jax.experimental import pallas as pl
from jax.experimental.pallas import tpu as pltpu

LANE = 128                    # vreg lane width; flat tensor viewed as (rows, 128)
BLOCK_ROWS_P1 = 16384         # 8 MiB f32 blocks for the min/max pass
BLOCK_ROWS_P2 = 8192          # 4 MiB f32 blocks for the quantize pass
FUSED_ROWS_SMALL_VMEM = 8192  # 4 MiB fused threshold (v7x 64 MiB VMEM / unknown)
FUSED_ROWS_BIG_VMEM = 32768   # 16 MiB fused threshold (v5e/v6e 128 MiB VMEM)


class QMode(enum.Enum):
    DET = "det"
    STOCH = "stoch"


# ---------------------------------------------------------------------------
# shared in-kernel helpers
# ---------------------------------------------------------------------------
def _hash_uniform(row0, shape, seed_u32):
    """Deterministic U[0,1) per-element noise from a counter-based integer hash.

    Pure VPU integer ops (shift/xor/mul/convert): portable to the Pallas
    interpreter and all TPU generations — no pltpu.prng_* primitives.
    TODO(synk): switch back to pltpu.prng_random_bits when targeting only real
    TPUs; the hardware PRNG is cheaper on the VALU slot (relevant on v7x).
    """
    r = jax.lax.broadcasted_iota(jnp.int32, shape, 0)
    c = jax.lax.broadcasted_iota(jnp.int32, shape, 1)
    row0 = jnp.asarray(row0, dtype=jnp.int32)
    idx = ((row0 + r) * shape[1] + c).astype(jnp.uint32)   # global element index
    z = idx ^ (seed_u32 * jnp.uint32(0x9E3779B9))
    z = (z ^ (z >> 16)) * jnp.uint32(0x7FEB352D)
    z = (z ^ (z >> 15)) * jnp.uint32(0x846CA68B)
    z = z ^ (z >> 16)
    mant = (z >> 8).astype(jnp.int32)                      # top 24 bits: [0, 2^24)
    return mant.astype(jnp.float32) * jnp.float32(1.0 / (1 << 24))   # [0, 1)


def _quantize_block(x_f32, mn, mx, num_bits, noise=None):
    """Quantize one f32 block given the global min/max scalars."""
    levels = (2.0 ** num_bits) - 1.0
    span = mx - mn
    scale = levels / span        # one scalar divide
    inv_scale = span / levels    # one scalar divide; per-element op is a multiply
    lo = -((2.0 ** (num_bits - 1)) + 1.0)
    hi = 2.0 ** (num_bits - 1)
    v = jnp.clip(x_f32 * scale, lo, hi)
    if noise is None:            # deterministic
        q = jnp.round(v)
    else:                        # stochastic: add(-0.5).round().add(noise)
        q = jnp.round(v - 0.5) + noise
    return q * inv_scale


# ---------------------------------------------------------------------------
# fused single-pass kernel (whole tensor resident in VMEM): 1 read + 1 write
# ---------------------------------------------------------------------------
def _fused_kernel(seed_ref, x_ref, o_ref, *, num_bits, stoch):
    x = x_ref[...].astype(jnp.float32)
    mn = jnp.min(x)
    mx = jnp.max(x)
    noise = None
    if stoch:
        noise = _hash_uniform(0, x.shape, seed_ref[0].astype(jnp.uint32))
    o_ref[...] = _quantize_block(x, mn, mx, num_bits, noise).astype(o_ref.dtype)


# ---------------------------------------------------------------------------
# large-tensor pass 1: global min/max
#   grid = (ncsplit, tiles_per_core); leading axis "parallel" (2 TCs on v7x);
#   each core accumulates into its own resident (1, 8, 128) output block.
#   All blocks are full (no tail masking) — the row tail is handled in the
#   wrapper — so the loop body is 2 elementwise min/max per vreg, hidden
#   under the input DMA.
# ---------------------------------------------------------------------------
def _minmax_kernel(x_ref, min_ref, max_ref, *, block_rows):
    i = pl.program_id(1)

    @pl.when(i == 0)
    def _():
        min_ref[...] = jnp.full(min_ref.shape, jnp.inf, dtype=jnp.float32)
        max_ref[...] = jnp.full(max_ref.shape, -jnp.inf, dtype=jnp.float32)

    x = x_ref[...].astype(jnp.float32)
    # (block_rows,128) -> (block_rows//8, 8, 128) is tile-compatible; reducing
    # the leading axis is elementwise across vregs (pure VPU).
    xr = x.reshape(block_rows // 8, 8, LANE)
    min_ref[...] = jnp.minimum(min_ref[...], jnp.min(xr, axis=0)[None])
    max_ref[...] = jnp.maximum(max_ref[...], jnp.max(xr, axis=0)[None])


# ---------------------------------------------------------------------------
# large-tensor pass 2: elementwise quantization ("parallel" grid)
# ---------------------------------------------------------------------------
def _quant_kernel(mm_ref, seed_ref, x_ref, o_ref, *, num_bits, block_rows, stoch):
    mn = mm_ref[0]
    mx = mm_ref[1]
    x = x_ref[...].astype(jnp.float32)
    noise = None
    if stoch:
        row0 = pl.program_id(0) * block_rows
        noise = _hash_uniform(row0, x.shape, seed_ref[0].astype(jnp.uint32))
    o_ref[...] = _quantize_block(x, mn, mx, num_bits, noise).astype(o_ref.dtype)


# ---------------------------------------------------------------------------
# Python wrapper
# ---------------------------------------------------------------------------
def _has_big_vmem():
    """True on chips with >=100 MiB VMEM (v5e/v6e); False on v7x / unknown."""
    try:
        info_fn = getattr(pltpu, "get_tpu_info", None)
        if info_fn is None:
            return False
        vmem = getattr(info_fn(), "vmem_capacity_bytes", None)
        return bool(vmem is not None and vmem >= (100 << 20))
    except Exception:
        return False


def quantize_pallas(x, qmode=QMode.DET, num_bits=4, seed=0,
                    fused_max_rows=None, block_rows_p1=None, block_rows_p2=None):
    mode = qmode.value if isinstance(qmode, QMode) else str(qmode)
    stoch = (mode == QMode.STOCH.value)

    big_vmem = _has_big_vmem()
    if fused_max_rows is None:
        fused_max_rows = FUSED_ROWS_BIG_VMEM if big_vmem else FUSED_ROWS_SMALL_VMEM
    if block_rows_p1 is None:
        block_rows_p1 = BLOCK_ROWS_P1
    if block_rows_p2 is None:
        block_rows_p2 = BLOCK_ROWS_P2
    vmem_limit = (110 << 20) if big_vmem else (40 << 20)

    orig_shape = x.shape
    orig_dtype = x.dtype
    n = x.size

    flat = x.reshape(-1)
    n_pad = pl.cdiv(n, LANE) * LANE
    padded = n_pad != n
    if padded:
        # TODO(synk): the (<128-element) edge pad still copies the whole flat
        # tensor; a masked remainder tile would remove the extra read+write.
        flat = jnp.pad(flat, (0, n_pad - n), mode="edge")   # edge pad: min/max neutral
    rows = n_pad // LANE
    x2d = flat.reshape(rows, LANE)

    seed_arr = jnp.asarray([seed], dtype=jnp.int32)

    if rows <= fused_max_rows:
        # ------------- fused single pass: 1 read + 1 write of the tensor -------------
        out2d = pl.pallas_call(
            functools.partial(_fused_kernel, num_bits=num_bits, stoch=stoch),
            out_shape=jax.ShapeDtypeStruct((rows, LANE), orig_dtype),
            grid=(1,),
            in_specs=[pl.BlockSpec(memory_space=pltpu.SMEM),          # seed
                      pl.BlockSpec((rows, LANE), lambda i: (0, 0))],  # whole tensor
            out_specs=pl.BlockSpec((rows, LANE), lambda i: (0, 0)),
            compiler_params=pltpu.CompilerParams(vmem_limit_bytes=vmem_limit),
        )(seed_arr, x2d)
    else:
        # ---------------------- pass 1: global min/max ----------------------
        bp1 = max(8, min(block_rows_p1, (rows // 8) * 8))
        nt1 = rows // bp1                      # number of full blocks
        ncsplit = 2 if nt1 >= 2 else 1         # 2-way split -> both TCs on v7x
        tpc = nt1 // ncsplit                   # full tiles per core (no duplication)
        rows_main = ncsplit * tpc * bp1        # rows covered by the kernel

        min_part, max_part = pl.pallas_call(
            functools.partial(_minmax_kernel, block_rows=bp1),
            out_shape=(jax.ShapeDtypeStruct((ncsplit, 8, LANE), jnp.float32),
                       jax.ShapeDtypeStruct((ncsplit, 8, LANE), jnp.float32)),
            grid=(ncsplit, tpc),
            in_specs=[pl.BlockSpec((bp1, LANE),
                                   lambda c, i, _t=tpc: (c * _t + i, 0))],
            out_specs=(pl.BlockSpec((1, 8, LANE), lambda c, i: (c, 0, 0)),
                       pl.BlockSpec((1, 8, LANE), lambda c, i: (c, 0, 0))),
            compiler_params=pltpu.CompilerParams(
                dimension_semantics=("parallel", "arbitrary"),
                vmem_limit_bytes=vmem_limit),
        )(x2d)

        mn = jnp.min(min_part)
        mx = jnp.max(max_part)
        if rows_main < rows:
            # Row tail (< 2 blocks): tiny jnp reduce; keeps the kernel free of
            # partial blocks and per-step tail masking.
            tail = x2d[rows_main:, :].astype(jnp.float32)
            mn = jnp.minimum(mn, jnp.min(tail))
            mx = jnp.maximum(mx, jnp.max(tail))
        mm = jnp.stack([mn, mx]).astype(jnp.float32)   # (2,) scalars -> SMEM

        # ---------------------- pass 2: elementwise quantize ----------------------
        bp2 = max(8, min(block_rows_p2, (rows // 8) * 8))
        nt2 = pl.cdiv(rows, bp2)
        out2d = pl.pallas_call(
            functools.partial(_quant_kernel, num_bits=num_bits,
                              block_rows=bp2, stoch=stoch),
            out_shape=jax.ShapeDtypeStruct((rows, LANE), orig_dtype),
            grid=(nt2,),
            in_specs=[pl.BlockSpec(memory_space=pltpu.SMEM),           # (min, max)
                      pl.BlockSpec(memory_space=pltpu.SMEM),           # seed
                      pl.BlockSpec((bp2, LANE), lambda i: (i, 0))],    # x tile
            out_specs=pl.BlockSpec((bp2, LANE), lambda i: (i, 0)),
            compiler_params=pltpu.CompilerParams(
                dimension_semantics=("parallel",),
                vmem_limit_bytes=vmem_limit),
        )(mm, seed_arr, x2d)

    if padded:
        return out2d.reshape(-1)[:n].reshape(orig_shape)
    return out2d.reshape(orig_shape)


class QuantizeLayer:
    """JAX/Pallas equivalent of the PyTorch QuantizeLayer module (forward only)."""

    def __init__(self, qmode=QMode.DET, num_bits=4):
        self.qmode = qmode
        self.num_bits = num_bits

    def __call__(self, x, seed=0):
        return quantize_pallas(x, self.qmode, self.num_bits, seed)


# ---------------------------------------------------------------------------
# Pure-JAX reference (mirrors the PyTorch forward), for verification only.
# ---------------------------------------------------------------------------
def _quantize_ref(x, num_bits=4):
    x = x.astype(jnp.float32)
    scale = ((2.0 ** num_bits) - 1.0) / (jnp.max(x) - jnp.min(x))
    lo = -((2.0 ** (num_bits - 1)) + 1.0)
    hi = 2.0 ** (num_bits - 1)
    v = jnp.clip(x * scale, lo, hi)
    return jnp.round(v) / scale


if __name__ == "__main__":
    key = jax.random.PRNGKey(0)
    k1, k2, k3 = jax.random.split(key, 3)

    det_layer = QuantizeLayer(QMode.DET, num_bits=4)
    stoch_layer = QuantizeLayer(QMode.STOCH, num_bits=4)

    # ---- small NCHW activation (fused single-pass path) ----
    x = jax.random.normal(k1, (2, 4, 16, 16), dtype=jnp.float32)
    y_det = jax.block_until_ready(det_layer(x))
    y_ref = _quantize_ref(x, num_bits=4)
    assert y_det.shape == x.shape and y_det.dtype == x.dtype
    assert jnp.allclose(y_det, y_ref, rtol=1e-5, atol=1e-6), "det mismatch (fused)"

    y_st = jax.block_until_ready(stoch_layer(x, seed=7))
    inv_scale = (jnp.max(x) - jnp.min(x)) / 15.0
    assert bool(jnp.all(jnp.isfinite(y_st)))
    assert float(jnp.max(jnp.abs(y_st - y_det))) <= 1.01 * float(inv_scale)

    # ---- numel not a multiple of 128 (edge-padded fused path) ----
    x_odd = jax.random.normal(k3, (3, 5, 7, 11), dtype=jnp.float32)
    y_odd = jax.block_until_ready(det_layer(x_odd))
    assert jnp.allclose(y_odd, _quantize_ref(x_odd, 4), rtol=1e-5, atol=1e-6), \
        "det mismatch (padded)"

    # ---- tiled two-pass path, forced with small blocks so the test stays small:
    #      exercises the 2-way-split min/max pass, the wrapper row tail, the
    #      single-split path, and a partial last block in the quantize pass ----
    x_t = jax.random.normal(k2, (2, 9, 64, 128), dtype=jnp.float32)   # 1152 rows
    y_t_ref = _quantize_ref(x_t, num_bits=4)

    y_t_a = jax.block_until_ready(quantize_pallas(
        x_t, QMode.DET, 4,
        fused_max_rows=64, block_rows_p1=384, block_rows_p2=256))
    assert jnp.allclose(y_t_a, y_t_ref, rtol=1e-5, atol=1e-6), "det mismatch (tiled A)"

    y_t_b = jax.block_until_ready(quantize_pallas(
        x_t, QMode.DET, 4,
        fused_max_rows=64, block_rows_p1=4096, block_rows_p2=512))
    assert jnp.allclose(y_t_b, y_t_ref, rtol=1e-5, atol=1e-6), "det mismatch (tiled B)"

    y_t_st = jax.block_until_ready(quantize_pallas(
        x_t, QMode.STOCH, 4, seed=3,
        fused_max_rows=64, block_rows_p1=384, block_rows_p2=256))
    inv_scale_t = (jnp.max(x_t) - jnp.min(x_t)) / 15.0
    assert bool(jnp.all(jnp.isfinite(y_t_st)))
    assert float(jnp.max(jnp.abs(y_t_st - y_t_a))) <= 1.01 * float(inv_scale_t)

    print("KERNEL_OK")
</pallas_src>

<mosaic_0001>
module attributes {stable_mosaic.version = 11 : i64} {
  func.func @_fused_kernel(%arg0: i32, %arg1: memref<1xi32, #tpu.memory_space<smem>>, %arg2: memref<16x128xf32, #tpu.memory_space<vmem>>, %arg3: memref<16x128xf32, #tpu.memory_space<vmem>>) attributes {dimension_semantics = [#tpu.dimension_semantics<arbitrary>], iteration_bounds = array<i64: 1>, scalar_prefetch = 0 : i64, scratch_operands = 0 : i64, tpu.core_type = #tpu.core_type<tc>, window_params = [{transform_indices = @transform_0, window_bounds = array<i64: 1>}, {pipeline_mode = #tpu.pipeline_mode<synchronous>, transform_indices = @transform_1, window_bounds = array<i64: 16, 128>}, {pipeline_mode = #tpu.pipeline_mode<synchronous>, transform_indices = @transform_2, window_bounds = array<i64: 16, 128>}]} {
    %c0 = arith.constant 0 : index
    %c0_0 = arith.constant 0 : index
    %0 = vector.load %arg2[%c0, %c0_0] : memref<16x128xf32, #tpu.memory_space<vmem>>, vector<16x128xf32>
    %1 = vector.shape_cast %0 : vector<16x128xf32> to vector<1x16x128xf32>
    %cst = arith.constant dense<0x7F800000> : vector<1xf32>
    %2 = vector.multi_reduction <minimumf>, %1, %cst [1, 2] : vector<1x16x128xf32> to vector<1xf32>
    %3 = vector.shape_cast %2 : vector<1xf32> to vector<1x1x1xf32>
    %4 = vector.extract %3[0, 0, 0] : f32 from vector<1x1x1xf32>
    %5 = vector.shape_cast %0 : vector<16x128xf32> to vector<1x16x128xf32>
    %cst_1 = arith.constant dense<0xFF800000> : vector<1xf32>
    %6 = vector.multi_reduction <maximumf>, %5, %cst_1 [1, 2] : vector<1x16x128xf32> to vector<1xf32>
    %7 = vector.shape_cast %6 : vector<1xf32> to vector<1x1x1xf32>
    %8 = vector.extract %7[0, 0, 0] : f32 from vector<1x1x1xf32>
    %9 = arith.subf %8, %4 : f32
    %cst_2 = arith.constant 1.500000e+01 : f32
    %10 = arith.divf %cst_2, %9 : f32
    %cst_3 = arith.constant 1.500000e+01 : f32
    %11 = arith.divf %9, %cst_3 : f32
    %12 = vector.broadcast %10 : f32 to vector<16x128xf32>
    %13 = arith.mulf %0, %12 : vector<16x128xf32>
    %cst_4 = arith.constant -9.000000e+00 : f32
    %cst_5 = arith.constant 8.000000e+00 : f32
    %14 = vector.broadcast %cst_4 : f32 to vector<16x128xf32>
    %15 = arith.maximumf %14, %13 : vector<16x128xf32>
    %16 = vector.broadcast %cst_5 : f32 to vector<16x128xf32>
    %17 = arith.minimumf %16, %15 : vector<16x128xf32>
    %18 = math.roundeven %17 : vector<16x128xf32>
    %19 = vector.broadcast %11 : f32 to vector<16x128xf32>
    %20 = arith.mulf %18, %19 : vector<16x128xf32>
    %c0_6 = arith.constant 0 : index
    %c0_7 = arith.constant 0 : index
    %21 = vector.load %arg3[%c0_6, %c0_7] : memref<16x128xf32, #tpu.memory_space<vmem>>, vector<16x128xf32>
    tpu.vector_store %arg3[%c0_6, %c0_7], %20 {strides = array<i32>} : memref<16x128xf32, #tpu.memory_space<vmem>>, vector<16x128xf32>,
    return
  }
  func.func @transform_0(%arg0: i32) -> i32 {
    %c0_i32 = arith.constant 0 : i32
    %c0_i32_0 = arith.constant 0 : i32
    return %c0_i32 : i32
  }
  func.func @transform_1(%arg0: i32) -> (i32, i32) {
    %c0_i32 = arith.constant 0 : i32
    %c0_i32_0 = arith.constant 0 : i32
    %c0_i32_1 = arith.constant 0 : i32
    return %c0_i32, %c0_i32_0 : i32, i32
  }
  func.func @transform_2(%arg0: i32) -> (i32, i32) {
    %c0_i32 = arith.constant 0 : i32
    %c0_i32_0 = arith.constant 0 : i32
    %c0_i32_1 = arith.constant 0 : i32
    return %c0_i32, %c0_i32_0 : i32, i32
  }
}

</mosaic_0001>

<bundles_post_ra>
// kernel: tpu_custom_call.1
= control target key start
LH: loop header
LB: loop body
LE: loop exit
PB: predicated region body
PF: predicated region fallthrough
CT: control target
= control target key end

     0   :  { %8 = vsyncpa [#allocation4], 0  ;;  %s232_s0 = inlined_call_operand.<no memory space> [shape: s32[1], index: 0, kind: input, shape index: {}]   ;;  %s233_s1 = inlined_call_operand.hbm [shape: f32[16,128], index: 1, kind: input, shape index: {}]   ;;  %s234_s2 = inlined_call_operand.hbm [shape: f32[16,128], index: 2, kind: output, shape index: {}]  }
   0x1   :  { %9 = vsyncpa [#allocation5], 0  ;;  %s16_s11 = sshll.u32 %s233_s1, 4  ;;  %s196_s12 = smov [#allocation3]   ;;  %s17_s11 = int_to_ptr.hbm [resolvable:$true] %s16_s11 }
   0x2   :  { %s18_s13 = sshll.u32 %s196_s12, 4  ;;  %s197_s14 = smov 128   ;;  %s19_s13 = int_to_ptr.vmem [resolvable:$true] %s18_s13 }
   0x3   :  { %s198_s15 = smov 8  }
   0x4   :  { %24 = dma.hbm_to_vmem [thread:$0]  %s17_s11, 256, %s19_s13, [#allocation4], %s197_s14, %s197_s14, %s198_s15  }
   0x5   :  { %192 = dma.done.wait [#allocation4], 256  }
   0x6   :  { %193 = vsyncadd [#allocation4], 4294967040  ;;  %v29_v0 = vld [vmem:[#allocation3] sm:$0xff]  ;;  %v30_v1 = vld [vmem:[#allocation3 + $0x8] sm:$0xff]  ;;  %v199_v18 = vmov 15.0   ;;  %s200_s21 = smov [#allocation6]  }
   0x7   :  { %v31_v2 = vmin.f32 %v29_v0, %v30_v1  ;;  %v41_v3 = vmax.f32 %v29_v0, %v30_v1  ;;  %140 = vrcp.f32 %v199_v18  ;;  %s96_s22 = sshll.u32 %s200_s21, 4  ;;  %s98_s25 = sshll.u32 %s234_s2, 4  ;;  %s97_s22 = int_to_ptr.vmem [resolvable:$true] %s96_s22  ;;  %s99_s25 = int_to_ptr.hbm [resolvable:$true] %s98_s25 }
   0x9   :  { %32 = vmin.xlane.f32.xlu0 %v31_v2 }
   0xd   :  { %v141_v19 = vpop.eup %140 }
   0xe   :  { %v70_v21 = vmul.f32 15.0, %v141_v19  ;;  %vm74_vm1 = vweird.f32 %v141_v19 }
  0x10   :  { %v71_v22 = vsub.f32 1.0, %v70_v21 }
  0x11   :  { %42 = vmax.xlane.f32.xlu0 %v41_v3 }
  0x12   :  { %v72_v25 = vmul.f32 %v141_v19, %v71_v22 }
  0x14   :  { %v73_v30 = vadd.f32 %v141_v19, %v72_v25 }
  0x16   :  { %v75_v34 = vsel %vm74_vm1, %v141_v19, %v73_v30 }
  0x7c   :  { %v33_v4 = vpop.xlane.xlu0 %32 }
  0x7d   :  { %v34_v5 = vrot.slane %v33_v4, 4 }
  0x7f   :  { %v35_v6 = vmin.f32 %v33_v4, %v34_v5 }
  0x81   :  { %v36_v7 = vrot.slane %v35_v6, 2 }
  0x83   :  { %v37_v8 = vmin.f32 %v35_v6, %v36_v7 }
  0x84   :  { %v43_v9 = vpop.xlane.xlu0 %42 }
  0x85   :  { %v44_v10 = vrot.slane %v43_v9, 4  ;;  %v38_v11 = vrot.slane %v37_v8, 1 }
  0x87   :  { %v45_v12 = vmax.f32 %v43_v9, %v44_v10  ;;  %v39_v13 = vmin.f32 %v37_v8, %v38_v11 }
  0x89   :  { %v46_v14 = vrot.slane %v45_v12, 2  ;;  %111 = vpush %v39_v13 }
  0x8b   :  { %v47_v15 = vmax.f32 %v45_v12, %v46_v14 }
  0x8d   :  { %v48_v16 = vrot.slane %v47_v15, 1 }
  0x8f   :  { %v49_v17 = vmax.f32 %v47_v15, %v48_v16 }
  0x91   :  { %113 = vpush %v49_v17 }
  0xba   :  { %s112_s0 = spop %111 }
  0xc2   :  { %s114_s1 = spop %113 }
  0xc3   :  { %s222_s16 = ssub.f32 %s114_s1, %s112_s0 }
  0xc5   :  { %v52_v20 = vstv %s222_s16 }
  0xc6   :  { %142 = vrcp.f32 %v52_v20  ;;  %v64_v27 = vand.u32 2147483648, %v52_v20  ;;  %v62_v29 = vand.u32 2147483647, %v52_v20  ;;  %vm58_vm2 = vweird.f32 %v52_v20 }
  0xc8   :  { %v65_v32 = vor.u32 1.1754944e-38, %v64_v27  ;;  %vm63_vm4 = vcmp.eq.f32.partialorder %v62_v29, 8.507059e+37 }
  0xcc   :  { %v143_v23 = vpop.eup %142 }
  0xcd   :  { %v54_v24 = vmul.f32 %v143_v23, %v52_v20  ;;  %vm59_vm0 = vweird.f32 %v143_v23 }
  0xce   :  { %vm60_vm3 = vmor %vm58_vm2, %vm59_vm0 }
  0xcf   :  { %v55_v26 = vsub.f32 1.0, %v54_v24 }
  0xd1   :  { %v56_v28 = vmul.f32 %v143_v23, %v55_v26 }
  0xd3   :  { %v57_v31 = vadd.f32 %v143_v23, %v56_v28 }
  0xd5   :  { %v61_v33 = vsel %vm60_vm3, %v143_v23, %v57_v31 }
  0xd6   :  { %v66_v35 = vsel %vm63_vm4, %v65_v32, %v61_v33 }
  0xd7   :  { %115 = vpush %v66_v35 }
  0xd8   :  { %117 = vpush %v75_v34 }
 0x108   :  { %s116_s17 = spop %115 }
 0x109   :  { %s68_s18 = smul.f32 15.0, %s116_s17  ;;  %s118_s19 = spop %117 }
 0x10a   :  { %s77_s20 = smul.f32 %s118_s19, %s222_s16 }
 0x10b   :  { %v78_v36 = vstv %s68_s18 }
 0x10c   :  { %v79_v37 = vmul.f32 %v78_v36, %v29_v0  ;;  %v80_v38 = vmul.f32 %v78_v36, %v30_v1  ;;  %v87_v56 = vstv %s77_s20 }
 0x10e   :  { %v81_v39 = vmax.f32 %v79_v37, -9.0  ;;  %v82_v40 = vmax.f32 %v80_v38, -9.0 }
 0x110   :  { %v83_v41 = vmin.f32 %v81_v39, 8.0  ;;  %v84_v42 = vmin.f32 %v82_v40, 8.0 }
 0x112   :  { %v121_v43 = vcvt.f32.s32 %v83_v41  ;;  %v129_v44 = vcvt.f32.s32 %v84_v42  ;;  %v119_v46 = vand.u32 2147483647, %v83_v41  ;;  %v124_v49 = vand.u32 2147483648, %v83_v41 }
 0x113   :  { %v127_v50 = vand.u32 2147483647, %v84_v42  ;;  %v132_v52 = vand.u32 2147483648, %v84_v42 }
 0x114   :  { %v122_v45 = vcvt.s32.f32 %v121_v43  ;;  %v130_v47 = vcvt.s32.f32 %v129_v44  ;;  %vm120_vm5 = vcmp.lt.f32.partialorder %v119_v46, 8388608.0 }
 0x115   :  { %vm128_vm6 = vcmp.lt.f32.partialorder %v127_v50, 8388608.0 }
 0x116   :  { %v123_v48 = vand.u32 2147483647, %v122_v45  ;;  %v131_v51 = vand.u32 2147483647, %v130_v47 }
 0x118   :  { %v125_v53 = vor.u32 %v124_v49, %v123_v48  ;;  %v133_v54 = vor.u32 %v132_v52, %v131_v51 }
 0x11a   :  { %v126_v55 = vsel %vm120_vm5, %v125_v53, %v83_v41  ;;  %v134_v57 = vsel %vm128_vm6, %v133_v54, %v84_v42 }
 0x11b   :  { %v88_v58 = vmul.f32 %v126_v55, %v87_v56  ;;  %v89_v59 = vmul.f32 %v134_v57, %v87_v56 }
 0x11d   :  { %90 = vst [vmem:[#allocation6] sm:$0xff] %v88_v58 }
 0x11e   :  { %91 = vst [vmem:[#allocation6 + $0x8] sm:$0xff] %v89_v59 }
 0x11f   :  { %104 = dma.vmem_to_hbm [thread:$0]  %s97_s22, 256, %s99_s25, [#allocation5], %s197_s14, %s197_s14, %s198_s15  }
 0x120   :  { %194 = dma.done.wait [#allocation5], 256  }
 0x121   :  { %195 = vsyncadd [#allocation5], 4294967040 }
 0x122   :  { %109 = vsyncpa [#allocation4], 1 }
 0x123   :  { %110 = vsyncpa [#allocation5], 1 }

</bundles_post_ra>
